<compile_context>
chip_gen: v7x
topology: tpu7x:2x2x1
jax: 0.10.0
libtpu: 0.0.40
codegen_flags: <defaults>
</compile_context>

<pallas_src>
import functools

import jax
import jax.numpy as jnp
from jax.experimental import pallas as pl
from jax.experimental.pallas import tpu as pltpu

_NEG_BIG = -1e30   # effectively -inf for the padded softmax lanes
_H = 128           # padded hidden / output lane width
_KIN = 16          # padded input feature width


def _round_up(n, m):
    return ((n + m - 1) // m) * m


def _lr_kernel(x_ref, w_ref, b_ref, o_ref):
    # x tile: (tb, 16) bf16 (features 6..15 are zero padding)
    x = x_ref[...]

    # fc1: (tb,16) @ (16,128); zero-padded weight rows/cols keep lanes 64..127 == 0
    h = jnp.dot(x, w_ref[0, 0:_KIN, :], preferred_element_type=jnp.float32) + b_ref[0]
    h = jnp.tanh(h.astype(jnp.bfloat16))          # bf16 tanh + bf16 intermediate
    # fc2
    h = jnp.tanh((jnp.dot(h, w_ref[1], preferred_element_type=jnp.float32)
                  + b_ref[1]).astype(jnp.bfloat16))
    # fc3
    h = jnp.tanh((jnp.dot(h, w_ref[2], preferred_element_type=jnp.float32)
                  + b_ref[2]).astype(jnp.bfloat16))
    # fc6: lanes 11..127 get bias -1e30 so exp() below underflows to exactly 0
    logits = (jnp.dot(h, w_ref[3], preferred_element_type=jnp.float32) + b_ref[3])

    # softmax over the feature (lane) axis, f32 math, bf16 lane-dense store
    m = jnp.max(logits, axis=-1, keepdims=True)
    e = jnp.exp(logits - m)
    s = jnp.sum(e, axis=-1, keepdims=True)
    o_ref[...] = (e * pl.reciprocal(s, approx=True)).astype(o_ref.dtype)


def pack_params(params):
    """Pack [in,out] weights / [1,out] biases into one bf16 weight slab + one f32 bias slab."""
    (w1, b1), (w2, b2), (w3, b3), (w4, b4) = params
    w_slab = jnp.zeros((4, _H, _H), jnp.float32)
    w_slab = w_slab.at[0, :6, :64].set(w1)
    w_slab = w_slab.at[1, :64, :64].set(w2)
    w_slab = w_slab.at[2, :64, :64].set(w3)
    w_slab = w_slab.at[3, :64, :11].set(w4)

    b_slab = jnp.zeros((4, 1, _H), jnp.float32)
    b_slab = b_slab.at[0, 0, :64].set(b1.reshape(-1))
    b_slab = b_slab.at[1, 0, :64].set(b2.reshape(-1))
    b_slab = b_slab.at[2, 0, :64].set(b3.reshape(-1))
    b_slab = b_slab.at[3, 0, :11].set(b4.reshape(-1))
    b_slab = b_slab.at[3, 0, 11:].set(_NEG_BIG)
    return w_slab.astype(jnp.bfloat16), b_slab


@functools.partial(jax.jit, static_argnames=("tb_max",))
def lr_forward(x, w_slab, b_slab, *, tb_max=2048):
    """x: [B, 6] float32 -> probs: [B, 11] float32."""
    B = x.shape[0]
    # Batch tile: multiple of 16 sublanes (bf16 packing), capped at tb_max, and sized
    # so the grid has >= 2 steps whenever B allows it (v7x's second TensorCore only
    # gets work via "parallel" grid steps).
    b16 = _round_up(max(B, 1), 16)
    tb = min(tb_max, _round_up(pl.cdiv(b16, 2), 16))
    Bp = _round_up(B, tb)

    # pad features 6 -> 16 and batch B -> Bp, casting to bf16 in the same pass
    x_p = jnp.zeros((Bp, _KIN), jnp.bfloat16).at[:B, :6].set(x.astype(jnp.bfloat16))

    flops = 2 * Bp * (6 * 64 + 64 * 64 + 64 * 64 + 64 * 11)
    transcendentals = Bp * (3 * 64 + _H + 1)
    bytes_accessed = (Bp * _KIN * 2 + Bp * _H * 2
                      + int(w_slab.size) * 2 + int(b_slab.size) * 4)

    out = pl.pallas_call(
        _lr_kernel,
        out_shape=jax.ShapeDtypeStruct((Bp, _H), jnp.bfloat16),
        grid=(Bp // tb,),
        in_specs=[
            pl.BlockSpec((tb, _KIN), lambda i: (i, 0)),        # activation tile (pipelined)
            pl.BlockSpec((4, _H, _H), lambda i: (0, 0, 0)),    # weight slab: VMEM-resident
            pl.BlockSpec((4, 1, _H), lambda i: (0, 0, 0)),     # bias slab:   VMEM-resident
        ],
        out_specs=pl.BlockSpec((tb, _H), lambda i: (i, 0)),    # lane-dense, unmasked store
        compiler_params=pltpu.CompilerParams(
            dimension_semantics=("parallel",)),
        cost_estimate=pl.CostEstimate(
            flops=flops, transcendentals=transcendentals,
            bytes_accessed=bytes_accessed),
    )(x_p, w_slab, b_slab)

    return out[:B, :11].astype(jnp.float32)


def init_params(key):
    """Deterministic params matching nn.Linear shapes (stored as [in, out])."""
    dims = [(6, 64), (64, 64), (64, 64), (64, 11)]
    params = []
    for (din, dout) in dims:
        key, kw, kb = jax.random.split(key, 3)
        bound = 1.0 / (din ** 0.5)   # torch-default-like U(-1/sqrt(din), 1/sqrt(din))
        w = jax.random.uniform(kw, (din, dout), jnp.float32, -bound, bound)
        b = jax.random.uniform(kb, (1, dout), jnp.float32, -bound, bound)
        params.append((w, b))
    return params


def lr_reference(x, params):
    """Pure-JAX f32 reference for sanity checking."""
    (w1, b1), (w2, b2), (w3, b3), (w4, b4) = params
    h = jnp.tanh(x @ w1 + b1)
    h = jnp.tanh(h @ w2 + b2)
    h = jnp.tanh(h @ w3 + b3)
    return jax.nn.softmax(h @ w4 + b4, axis=1)


if __name__ == "__main__":
    key = jax.random.PRNGKey(0)
    kx, kp, kx2 = jax.random.split(key, 3)

    params = init_params(kp)
    w_slab, b_slab = pack_params(params)

    # small demo batch (single grid step)
    B = 8
    x = jax.random.normal(kx, (B, 6), dtype=jnp.float32)
    out = jax.block_until_ready(lr_forward(x, w_slab, b_slab))
    ref = lr_reference(x, params)
    assert out.shape == (B, 11)
    # bf16 MXU operands / bf16 tanh / approx reciprocal -> relaxed tolerance vs f32 ref
    assert jnp.allclose(out, ref, atol=2e-2, rtol=2e-2)
    # softmax rows sum to ~1 (bf16 output + approx reciprocal -> loosened tolerance)
    assert jnp.allclose(jnp.sum(out, axis=1), jnp.ones((B,)), atol=1e-2)

    # larger, non-multiple-of-tile batch to exercise the batch grid + padding path
    B2 = 300
    x2 = jax.random.normal(kx2, (B2, 6), dtype=jnp.float32)
    out2 = jax.block_until_ready(lr_forward(x2, w_slab, b_slab, tb_max=128))
    ref2 = lr_reference(x2, params)
    assert out2.shape == (B2, 11)
    assert jnp.allclose(out2, ref2, atol=2e-2, rtol=2e-2)
    assert jnp.allclose(jnp.sum(out2, axis=1), jnp.ones((B2,)), atol=1e-2)

    print("KERNEL_OK")
</pallas_src>

<mosaic_0001>
module attributes {stable_mosaic.version = 11 : i64} {
  func.func @_lr_kernel(%arg0: i32, %arg1: memref<16x16xbf16, #tpu.memory_space<vmem>>, %arg2: memref<4x128x128xbf16, #tpu.memory_space<vmem>>, %arg3: memref<4x1x128xf32, #tpu.memory_space<vmem>>, %arg4: memref<16x128xbf16, #tpu.memory_space<vmem>>) attributes {dimension_semantics = [#tpu.dimension_semantics<parallel>], iteration_bounds = array<i64: 1>, scalar_prefetch = 0 : i64, scratch_operands = 0 : i64, tpu.core_type = #tpu.core_type<tc>, window_params = [{transform_indices = @transform_0, window_bounds = array<i64: 16, 16>}, {pipeline_mode = #tpu.pipeline_mode<synchronous>, transform_indices = @transform_1, window_bounds = array<i64: 4, 128, 128>}, {pipeline_mode = #tpu.pipeline_mode<synchronous>, transform_indices = @transform_2, window_bounds = array<i64: 4, 1, 128>}, {transform_indices = @transform_3, window_bounds = array<i64: 16, 128>}]} {
    %c0 = arith.constant 0 : index
    %c0_0 = arith.constant 0 : index
    %0 = vector.load %arg1[%c0, %c0_0] : memref<16x16xbf16, #tpu.memory_space<vmem>>, vector<16x16xbf16>
    %c0_1 = arith.constant 0 : index
    %c0_2 = arith.constant 0 : index
    %c0_3 = arith.constant 0 : index
    %1 = vector.load %arg2[%c0_1, %c0_2, %c0_3] : memref<4x128x128xbf16, #tpu.memory_space<vmem>>, vector<1x16x128xbf16>
    %2 = vector.shape_cast %1 : vector<1x16x128xbf16> to vector<16x128xbf16>
    %cst = arith.constant dense<0.000000e+00> : vector<16x128xf32>
    %3 = tpu.matmul %0, %2, %cst {dimension_numbers = #tpu.dot_dimension_numbers<[1], [0], [0], [1], [0, 0, 1, 1], [], []>} : vector<16x16xbf16>, vector<16x128xbf16>, vector<16x128xf32> -> vector<16x128xf32>
    %c0_4 = arith.constant 0 : index
    %c0_5 = arith.constant 0 : index
    %c0_6 = arith.constant 0 : index
    %4 = vector.load %arg3[%c0_4, %c0_5, %c0_6] : memref<4x1x128xf32, #tpu.memory_space<vmem>>, vector<1x1x128xf32>
    %5 = vector.shape_cast %4 : vector<1x1x128xf32> to vector<1x128xf32>
    %6 = vector.broadcast %5 : vector<1x128xf32> to vector<16x128xf32>
    %7 = arith.addf %3, %6 : vector<16x128xf32>
    %8 = arith.truncf %7 : vector<16x128xf32> to vector<16x128xbf16>
    %9 = math.tanh %8 : vector<16x128xbf16>
    %c1 = arith.constant 1 : index
    %c0_7 = arith.constant 0 : index
    %c0_8 = arith.constant 0 : index
    %10 = vector.load %arg2[%c1, %c0_7, %c0_8] : memref<4x128x128xbf16, #tpu.memory_space<vmem>>, vector<1x128x128xbf16>
    %11 = vector.shape_cast %10 : vector<1x128x128xbf16> to vector<128x128xbf16>
    %cst_9 = arith.constant dense<0.000000e+00> : vector<16x128xf32>
    %12 = tpu.matmul %9, %11, %cst_9 {dimension_numbers = #tpu.dot_dimension_numbers<[1], [0], [0], [1], [0, 0, 1, 1], [], []>} : vector<16x128xbf16>, vector<128x128xbf16>, vector<16x128xf32> -> vector<16x128xf32>
    %c1_10 = arith.constant 1 : index
    %c0_11 = arith.constant 0 : index
    %c0_12 = arith.constant 0 : index
    %13 = vector.load %arg3[%c1_10, %c0_11, %c0_12] : memref<4x1x128xf32, #tpu.memory_space<vmem>>, vector<1x1x128xf32>
    %14 = vector.shape_cast %13 : vector<1x1x128xf32> to vector<1x128xf32>
    %15 = vector.broadcast %14 : vector<1x128xf32> to vector<16x128xf32>
    %16 = arith.addf %12, %15 : vector<16x128xf32>
    %17 = arith.truncf %16 : vector<16x128xf32> to vector<16x128xbf16>
    %18 = math.tanh %17 : vector<16x128xbf16>
    %c2 = arith.constant 2 : index
    %c0_13 = arith.constant 0 : index
    %c0_14 = arith.constant 0 : index
    %19 = vector.load %arg2[%c2, %c0_13, %c0_14] : memref<4x128x128xbf16, #tpu.memory_space<vmem>>, vector<1x128x128xbf16>
    %20 = vector.shape_cast %19 : vector<1x128x128xbf16> to vector<128x128xbf16>
    %cst_15 = arith.constant dense<0.000000e+00> : vector<16x128xf32>
    %21 = tpu.matmul %18, %20, %cst_15 {dimension_numbers = #tpu.dot_dimension_numbers<[1], [0], [0], [1], [0, 0, 1, 1], [], []>} : vector<16x128xbf16>, vector<128x128xbf16>, vector<16x128xf32> -> vector<16x128xf32>
    %c2_16 = arith.constant 2 : index
    %c0_17 = arith.constant 0 : index
    %c0_18 = arith.constant 0 : index
    %22 = vector.load %arg3[%c2_16, %c0_17, %c0_18] : memref<4x1x128xf32, #tpu.memory_space<vmem>>, vector<1x1x128xf32>
    %23 = vector.shape_cast %22 : vector<1x1x128xf32> to vector<1x128xf32>
    %24 = vector.broadcast %23 : vector<1x128xf32> to vector<16x128xf32>
    %25 = arith.addf %21, %24 : vector<16x128xf32>
    %26 = arith.truncf %25 : vector<16x128xf32> to vector<16x128xbf16>
    %27 = math.tanh %26 : vector<16x128xbf16>
    %c3 = arith.constant 3 : index
    %c0_19 = arith.constant 0 : index
    %c0_20 = arith.constant 0 : index
    %28 = vector.load %arg2[%c3, %c0_19, %c0_20] : memref<4x128x128xbf16, #tpu.memory_space<vmem>>, vector<1x128x128xbf16>
    %29 = vector.shape_cast %28 : vector<1x128x128xbf16> to vector<128x128xbf16>
    %cst_21 = arith.constant dense<0.000000e+00> : vector<16x128xf32>
    %30 = tpu.matmul %27, %29, %cst_21 {dimension_numbers = #tpu.dot_dimension_numbers<[1], [0], [0], [1], [0, 0, 1, 1], [], []>} : vector<16x128xbf16>, vector<128x128xbf16>, vector<16x128xf32> -> vector<16x128xf32>
    %c3_22 = arith.constant 3 : index
    %c0_23 = arith.constant 0 : index
    %c0_24 = arith.constant 0 : index
    %31 = vector.load %arg3[%c3_22, %c0_23, %c0_24] : memref<4x1x128xf32, #tpu.memory_space<vmem>>, vector<1x1x128xf32>
    %32 = vector.shape_cast %31 : vector<1x1x128xf32> to vector<1x128xf32>
    %33 = vector.broadcast %32 : vector<1x128xf32> to vector<16x128xf32>
    %34 = arith.addf %30, %33 : vector<16x128xf32>
    %cst_25 = arith.constant dense<0xFF800000> : vector<16xf32>
    %35 = vector.multi_reduction <maximumf>, %34, %cst_25 [1] : vector<16x128xf32> to vector<16xf32>
    %36 = vector.shape_cast %35 : vector<16xf32> to vector<16x1xf32>
    %37 = vector.broadcast %36 : vector<16x1xf32> to vector<16x128xf32>
    %38 = arith.subf %34, %37 : vector<16x128xf32>
    %39 = math.exp %38 : vector<16x128xf32>
    %cst_26 = arith.constant dense<0.000000e+00> : vector<16xf32>
    %40 = vector.multi_reduction <add>, %39, %cst_26 [1] : vector<16x128xf32> to vector<16xf32>
    %41 = vector.shape_cast %40 : vector<16xf32> to vector<16x1xf32>
    %42 = tpu.reciprocal %41 {approx = true} : vector<16x1xf32> -> vector<16x1xf32>
    %43 = vector.broadcast %42 : vector<16x1xf32> to vector<16x128xf32>
    %44 = arith.mulf %39, %43 : vector<16x128xf32>
    %45 = arith.truncf %44 : vector<16x128xf32> to vector<16x128xbf16>
    %c0_27 = arith.constant 0 : index
    %c0_28 = arith.constant 0 : index
    %46 = vector.load %arg4[%c0_27, %c0_28] : memref<16x128xbf16, #tpu.memory_space<vmem>>, vector<16x128xbf16>
    tpu.vector_store %arg4[%c0_27, %c0_28], %45 {strides = array<i32>} : memref<16x128xbf16, #tpu.memory_space<vmem>>, vector<16x128xbf16>,
    return
  }
  func.func @transform_0(%arg0: i32) -> (i32, i32) {
    %c0_i32 = arith.constant 0 : i32
    %c0_i32_0 = arith.constant 0 : i32
    return %arg0, %c0_i32 : i32, i32
  }
  func.func @transform_1(%arg0: i32) -> (i32, i32, i32) {
    %c0_i32 = arith.constant 0 : i32
    %c0_i32_0 = arith.constant 0 : i32
    %c0_i32_1 = arith.constant 0 : i32
    %c0_i32_2 = arith.constant 0 : i32
    return %c0_i32, %c0_i32_0, %c0_i32_1 : i32, i32, i32
  }
  func.func @transform_2(%arg0: i32) -> (i32, i32, i32) {
    %c0_i32 = arith.constant 0 : i32
    %c0_i32_0 = arith.constant 0 : i32
    %c0_i32_1 = arith.constant 0 : i32
    %c0_i32_2 = arith.constant 0 : i32
    return %c0_i32, %c0_i32_0, %c0_i32_1 : i32, i32, i32
  }
  func.func @transform_3(%arg0: i32) -> (i32, i32) {
    %c0_i32 = arith.constant 0 : i32
    %c0_i32_0 = arith.constant 0 : i32
    return %arg0, %c0_i32 : i32, i32
  }
}

</mosaic_0001>

<bundles_post_ra>
// kernel: lr_forward.1
= control target key start
LH: loop header
LB: loop body
LE: loop exit
PB: predicated region body
PF: predicated region fallthrough
CT: control target
= control target key end

     0   :  { %8 = vsyncpa [#allocation3], 0  ;;  %s684_s12 = smov [#allocation2]   ;;  %s772_s0 = inlined_call_operand.vmem [shape: bf16[16,16], index: 0, kind: input, shape index: {}]   ;;  %s773_s1 = inlined_call_operand.hbm [shape: bf16[4,128,128], index: 1, kind: input, shape index: {}]   ;;  %s774_s2 = inlined_call_operand.vmem [shape: f32[4,1,128], index: 2, kind: input, shape index: {}]   ;;  %s775_s3 = inlined_call_operand.vmem [shape: bf16[16,128], index: 3, kind: output, shape index: {}]  }
   0x1   :  { %s16_s13 = sshll.u32 %s684_s12, 4  ;;  %s660_s16 = scalar_lea.hbm %s773_s1, 4096  ;;  %s17_s13 = int_to_ptr.vmem [resolvable:$true] %s16_s13 }
   0x2   :  { %p661_p0 = scmp.ne.s32.totalorder %s773_s1, %s660_s16  ;;  %p664_p1 = scmp.lt.u32.totalorder %s660_s16, %s773_s1 }
   0x4   :  { %p666_p2 = pnand %p664_p1, %p661_p0 }
   0x6   :  { %669 = shalt.err (!%p666_p2)
}
   0x7   :  { %s670_s21 = scalar_lea.vmem %s17_s13, 4096  ;;  %p675_p4 = scmp.lt.s32.totalorder %s17_s13, %s17_s13 }
   0x8   :  { %p671_p3 = scmp.ne.s32.totalorder %s17_s13, %s670_s21  ;;  %p676_p5 = scmp.lt.s32.totalorder %s670_s21, %s670_s21 }
   0xa   :  { %p677_p6 = por %p676_p5, %p675_p4 }
   0xc   :  { %p678_p7 = pnand %p677_p6, %p671_p3 }
   0xe   :  { %681 = shalt.err (!%p678_p7)
}
   0xf   :  { %s685_s22 = smov 64   ;;  %s686_s23 = smov 4  }
  0x10   :  { %22 = dma.hbm_to_vmem [thread:$0]  %s773_s1, 4096, %s17_s13, [#allocation3], %s685_s22, %s685_s22, %s686_s23  }
  0x11   :  { %682 = dma.done.wait [#allocation3], 4096  }
  0x12   :  { %683 = vsyncadd [#allocation3], 4294963200  ;;  %v687_v0 = vmov 0.0   ;;  %vm688_vm0 = vmmov 0   ;;  %v620_v1 = vld [vmem:[#allocation2] sm:$0xff]   ;;  %vm51_vm1 = vcmask 130048  }
  0x13   :  { %549 = vmatprep.subr.bf16.mxu0 %v687_v0  ;;  %551 = vmatprep.mubr.msk.bf16.mxu0 %vm688_vm0, %v687_v0  ;;  %v621_v2 = vld [vmem:[%s772_s0] sm:$0xff]   ;;  %v623_v4 = vld [vmem:[#allocation2 + $0x48] sm:$0xff]   ;;  %v624_v5 = vld [vmem:[#allocation2 + $0x50] sm:$0xff]  }
  0x14   :  { %555 = vmatprep.subr.bf16.mxu1 %v687_v0  ;;  %571 = vmatprep.mubr.msk.bf16.mxu1 %vm688_vm0, %v687_v0  ;;  %v622_v3 = vld [vmem:[#allocation2 + $0x40] sm:$0xff]   ;;  %v625_v6 = vld [vmem:[#allocation2 + $0x58] sm:$0xff]   ;;  %v627_v8 = vld [vmem:[#allocation2 + $0x68] sm:$0xff]  }
  0x15   :  { %550 = vmatpush3.bf16.msra.mxu0 %v620_v1  ;;  %556 = vmatpush3.bf16.msra.mxu1 %v622_v3  ;;  %v626_v7 = vld [vmem:[#allocation2 + $0x60] sm:$0xff]   ;;  %v628_v9 = vld [vmem:[#allocation2 + $0x70] sm:$0xff]   ;;  %v629_v10 = vld [vmem:[#allocation2 + $0x78] sm:$0xff]  }
  0x16   :  { %575 = vmatprep.subr.bf16.mxu0 %v687_v0  ;;  %557 = vmatprep.subr.bf16.mxu1 %v687_v0  ;;  %v630_v11 = vld [vmem:[#allocation2 + $0x80] sm:$0xff]   ;;  %v631_v12 = vld [vmem:[#allocation2 + $0x88] sm:$0xff]   ;;  %v632_v13 = vld [vmem:[#allocation2 + $0x90] sm:$0xff]  }
  0x17   :  { %v477_v14 = vld [vmem:[%s774_s2] ss:$0 sm:$0xff]  ;;  %v633_v23 = vld [vmem:[#allocation2 + $0x98] sm:$0xff]   ;;  %v635_v25 = vld [vmem:[#allocation2 + $0xa8] sm:$0xff]  }
  0x18   :  { %552 = vmatmul.mubr.msk.bf16.vlgmr.msra.gmra.mrb[0].mxu0 %vm51_vm1, %v621_v2  ;;  %v634_v24 = vld [vmem:[#allocation2 + $0xa0] sm:$0xff]   ;;  %v636_v26 = vld [vmem:[#allocation2 + $0xb0] sm:$0xff]   ;;  %v637_v27 = vld [vmem:[#allocation2 + $0xb8] sm:$0xff]  }
  0x19   :  { %591 = vmatprep.mubr.msk.bf16.mxu0 %vm688_vm0, %v687_v0  ;;  %558 = vmatpush3.bf16.msra.mxu1 %v623_v4  ;;  %v638_v28 = vld [vmem:[#allocation2 + $0xc0] sm:$0xff]   ;;  %v639_v29 = vld [vmem:[#allocation2 + $0xc8] sm:$0xff]   ;;  %v640_v30 = vld [vmem:[#allocation2 + $0xd0] sm:$0xff]  }
  0x1a   :  { %559 = vmatprep.subr.bf16.mxu1 %v687_v0  ;;  %576 = vmatpush3.bf16.msra.mxu0 %v630_v11  ;;  %v482_v31 = vld [vmem:[%s774_s2 + $0x1] ss:$0 sm:$0xff]  ;;  %v641_v40 = vld [vmem:[#allocation2 + $0xd8] sm:$0xff]   ;;  %v643_v42 = vld [vmem:[#allocation2 + $0xe8] sm:$0xff]  }
  0x1b   :  { %577 = vmatprep.subr.bf16.mxu0 %v687_v0  ;;  %v642_v41 = vld [vmem:[#allocation2 + $0xe0] sm:$0xff]   ;;  %v644_v43 = vld [vmem:[#allocation2 + $0xf0] sm:$0xff]   ;;  %v645_v44 = vld [vmem:[#allocation2 + $0xf8] sm:$0xff]  }
  0x1c   :  { %v492_v45 = vld [vmem:[%s774_s2 + $0x2] ss:$0 sm:$0xff]  ;;  %v502_v54 = vld [vmem:[%s774_s2 + $0x3] ss:$0 sm:$0xff] }
  0x1d   :  { %560 = vmatpush3.bf16.msra.mxu1 %v624_v5 }
  0x1e   :  { %561 = vmatprep.subr.bf16.mxu1 %v687_v0  ;;  %578 = vmatpush3.bf16.msra.mxu0 %v631_v12 }
  0x1f   :  { %579 = vmatprep.subr.bf16.mxu0 %v687_v0 }
  0x21   :  { %562 = vmatpush3.bf16.msra.mxu1 %v625_v6 }
  0x22   :  { %563 = vmatprep.subr.bf16.mxu1 %v687_v0  ;;  %580 = vmatpush3.bf16.msra.mxu0 %v632_v13 }
  0x23   :  { %581 = vmatprep.subr.bf16.mxu0 %v687_v0 }
  0x25   :  { %564 = vmatpush3.bf16.msra.mxu1 %v626_v7 }
  0x26   :  { %565 = vmatprep.subr.bf16.mxu1 %v687_v0  ;;  %582 = vmatpush3.bf16.msra.mxu0 %v633_v23 }
  0x27   :  { %583 = vmatprep.subr.bf16.mxu0 %v687_v0 }
  0x29   :  { %566 = vmatpush3.bf16.msra.mxu1 %v627_v8 }
  0x2a   :  { %567 = vmatprep.subr.bf16.mxu1 %v687_v0  ;;  %584 = vmatpush3.bf16.msra.mxu0 %v634_v24 }
  0x2b   :  { %585 = vmatprep.subr.bf16.mxu0 %v687_v0 }
  0x2d   :  { %568 = vmatpush3.bf16.msra.mxu1 %v628_v9 }
  0x2e   :  { %569 = vmatprep.subr.bf16.mxu1 %v687_v0  ;;  %586 = vmatpush3.bf16.msra.mxu0 %v635_v25 }
  0x2f   :  { %587 = vmatprep.subr.bf16.mxu0 %v687_v0 }
  0x31   :  { %570 = vmatpush3.bf16.msra.mxu1 %v629_v10 }
  0x32   :  { %595 = vmatprep.subr.bf16.mxu1 %v687_v0  ;;  %588 = vmatpush3.bf16.msra.mxu0 %v636_v26 }
  0x33   :  { %589 = vmatprep.subr.bf16.mxu0 %v687_v0 }
  0x36   :  { %590 = vmatpush3.bf16.msra.mxu0 %v637_v27 }
  0xeb   :  { %v89_v15 = vpop.f32.mrb[0].mxu0 }
  0xec   :  { %v553_v16 = vpop.f32.mrb[1].mxu0  ;;  %v90_v18 = vadd.f32 %v477_v14, %v89_v15 }
  0xed   :  { %v92_v17 = vpop.f32.mrb[2].mxu0 }
  0xee   :  { %v93_v19 = vadd.f32 %v477_v14, %v92_v17  ;;  %v554_v20 = vpop.f32.mrb[3].mxu0 }
  0xf0   :  { %v96_v21 = vpack.c.bf16 %v93_v19, %v90_v18 }
  0xf2   :  { %646 = vtanh.bf16 %v96_v21 }
  0xfd   :  { %v647_v22 = vpop.eup %646 }
  0xfe   :  { %572 = vmatmul.mubr.bf16.vlgmr.msra.gmra.mrb[0].mxu1 %v647_v22 }
  0xff   :  { %611 = vmatprep.mubr.msk.bf16.mxu1 %vm688_vm0, %v687_v0  ;;  %596 = vmatpush3.bf16.msra.mxu1 %v638_v28 }
 0x100   :  { %597 = vmatprep.subr.bf16.mxu1 %v687_v0 }
 0x103   :  { %598 = vmatpush3.bf16.msra.mxu1 %v639_v29 }
 0x104   :  { %599 = vmatprep.subr.bf16.mxu1 %v687_v0 }
 0x107   :  { %600 = vmatpush3.bf16.msra.mxu1 %v640_v30 }
 0x108   :  { %601 = vmatprep.subr.bf16.mxu1 %v687_v0 }
 0x10b   :  { %602 = vmatpush3.bf16.msra.mxu1 %v641_v40 }
 0x10c   :  { %603 = vmatprep.subr.bf16.mxu1 %v687_v0 }
 0x10f   :  { %604 = vmatpush3.bf16.msra.mxu1 %v642_v41 }
 0x110   :  { %605 = vmatprep.subr.bf16.mxu1 %v687_v0 }
 0x113   :  { %606 = vmatpush3.bf16.msra.mxu1 %v643_v42 }
 0x114   :  { %607 = vmatprep.subr.bf16.mxu1 %v687_v0 }
 0x117   :  { %608 = vmatpush3.bf16.msra.mxu1 %v644_v43 }
 0x118   :  { %609 = vmatprep.subr.bf16.mxu1 %v687_v0 }
 0x11b   :  { %610 = vmatpush3.bf16.msra.mxu1 %v645_v44 }
 0x1d1   :  { %v205_v32 = vpop.f32.mrb[0].mxu1 }
 0x1d2   :  { %v573_v33 = vpop.f32.mrb[1].mxu1  ;;  %v206_v35 = vadd.f32 %v482_v31, %v205_v32 }
 0x1d3   :  { %v208_v34 = vpop.f32.mrb[2].mxu1 }
 0x1d4   :  { %v209_v36 = vadd.f32 %v482_v31, %v208_v34  ;;  %v574_v37 = vpop.f32.mrb[3].mxu1 }
 0x1d6   :  { %v212_v38 = vpack.c.bf16 %v209_v36, %v206_v35 }
 0x1d8   :  { %648 = vtanh.bf16 %v212_v38 }
 0x1e3   :  { %v649_v39 = vpop.eup %648 }
 0x1e4   :  { %592 = vmatmul.mubr.bf16.vlgmr.msra.gmra.mrb[4].mxu0 %v649_v39 }
 0x2b7   :  { %v321_v46 = vpop.f32.mrb[4].mxu0 }
 0x2b8   :  { %v593_v47 = vpop.f32.mrb[5].mxu0  ;;  %v322_v49 = vadd.f32 %v492_v45, %v321_v46 }
 0x2b9   :  { %v324_v48 = vpop.f32.mrb[6].mxu0 }
 0x2ba   :  { %v325_v50 = vadd.f32 %v492_v45, %v324_v48  ;;  %v594_v51 = vpop.f32.mrb[7].mxu0 }
 0x2bc   :  { %v328_v52 = vpack.c.bf16 %v325_v50, %v322_v49 }
 0x2be   :  { %650 = vtanh.bf16 %v328_v52 }
 0x2c9   :  { %v651_v53 = vpop.eup %650 }
 0x2ca   :  { %612 = vmatmul.mubr.bf16.vlgmr.msra.gmra.mrb[4].mxu1 %v651_v53 }
 0x39d   :  { %v437_v55 = vpop.f32.mrb[4].mxu1 }
 0x39e   :  { %v438_v56 = vadd.f32 %v502_v54, %v437_v55  ;;  %v613_v57 = vpop.f32.mrb[5].mxu1 }
 0x39f   :  { %v440_v58 = vpop.f32.mrb[6].mxu1 }
 0x3a0   :  { %444 = vmax.xlane.f32.xlu0 %v438_v56  ;;  %v614_v59 = vpop.f32.mrb[7].mxu1  ;;  %v441_v60 = vadd.f32 %v502_v54, %v440_v58 }
 0x3a4   :  { %446 = vmax.xlane.f32.xlu0 %v441_v60 }
 0x42d   :  { %v445_v61 = vpop.xlane.xlu0 %444 }
 0x42e   :  { %v448_v62 = vsub.f32 %v438_v56, %v445_v61 }
 0x430   :  { %v450_v63 = vmul.f32 1.442695, %v448_v62 }
 0x431   :  { %v447_v0 = vpop.xlane.xlu0 %446 }
 0x432   :  { %652 = vpow2.f32 %v450_v63  ;;  %v449_v1 = vsub.f32 %v441_v60, %v447_v0 }
 0x434   :  { %v452_v2 = vmul.f32 1.442695, %v449_v1 }
 0x436   :  { %654 = vpow2.f32 %v452_v2 }
 0x43c   :  { %v653_v3 = vpop.eup %652 }
 0x43d   :  { %454 = vadd.xlane.f32.xlu1 %v653_v3 }
 0x440   :  { %v655_v4 = vpop.eup %654 }
 0x441   :  { %456 = vadd.xlane.f32.xlu1 %v655_v4 }
 0x4ca   :  { %v455_v5 = vpop.xlane.xlu1 %454 }
 0x4cb   :  { %656 = vrcp.f32 %v455_v5 }
 0x4ce   :  { %v457_v6 = vpop.xlane.xlu1 %456 }
 0x4cf   :  { %658 = vrcp.f32 %v457_v6 }
 0x4d5   :  { %v657_v7 = vpop.eup %656 }
 0x4d6   :  { %v460_v9 = vmul.f32 %v657_v7, %v653_v3 }
 0x4d9   :  { %v659_v8 = vpop.eup %658 }
 0x4da   :  { %v461_v10 = vmul.f32 %v659_v8, %v655_v4 }
 0x4dc   :  { %v518_v11 = vpack.c.bf16 %v461_v10, %v460_v9 }
 0x4de   :  { %519 = vst [vmem:[%s775_s3] sm:$0xff] %v518_v11  }
 0x4df   :  { %476 = vsyncpa [#allocation3], 1 }

</bundles_post_ra>
